<compile_context>
chip_gen: v6e
topology: v6e:2x2x1
jax: 0.10.0
libtpu: 0.0.40
codegen_flags: <defaults>
</compile_context>

<pallas_src>
import jax
import jax.numpy as jnp
from jax.experimental import pallas as pl
from jax.experimental.pallas import tpu as pltpu


LEAKY_SLOPE = 0.01  # PyTorch nn.LeakyReLU default
_MAX_TILE = 1024    # lane-tile cap (keeps (h1, tb) f32 activations manageable)


def _leaky_relu(v):
    # max(v, a*v) == LeakyReLU(v) for 0 < a < 1.
    return jnp.maximum(v, LEAKY_SLOPE * v)


def _round_up(n, m):
    return ((n + m - 1) // m) * m


# ---------------------------------------------------------------------------
# Packed parameter layout (built once, outside the per-step path).
#   * Weights: one bf16 buffer, PyTorch-native (out, in) layout, sections
#     16-row aligned (bf16 sublane packing).
#   * Biases:  one f32 column buffer (features in rows, 1 lane), 8-row aligned
#     sections; bias math stays f32 inside the kernel.
# ---------------------------------------------------------------------------
def _build_layout(state_dim, action_dim, h1, h2):
    d_in = state_dim + action_dim

    w_off, rw = {}, 0

    def _addw(name, rows):
        nonlocal rw
        w_off[name] = rw
        rw += _round_up(rows, 16)

    _addw("w1", h1)   # (h1, d_in)
    _addw("w2", h1)   # (h1, h1)
    _addw("w3", h2)   # (h2, h1)
    _addw("w4", h2)   # (h2, h2)
    _addw("w5", 1)    # (1, h2)
    Rw = _round_up(rw, 16)
    Cw = max(d_in, h1, h2)

    b_off, rb = {}, 0

    def _addb(name, rows):
        nonlocal rb
        b_off[name] = rb
        rb += _round_up(rows, 8)

    _addb("b1", h1)
    _addb("b2", h1)
    _addb("b3", h2)
    _addb("b4", h2)
    _addb("b5", 1)
    Rb = _round_up(rb, 8)

    return (w_off, Rw, Cw), (b_off, Rb)


def pack_params(params, state_dim, action_dim, h1, h2):
    """One-time conversion of PyTorch-layout params (w: (out,in), b: (out,))
    into kernel-ready buffers.  NOT in the per-step path."""
    (w_off, Rw, Cw), (b_off, Rb) = _build_layout(state_dim, action_dim, h1, h2)
    d_in = state_dim + action_dim

    W = jnp.zeros((Rw, Cw), jnp.float32)
    W = W.at[w_off["w1"]:w_off["w1"] + h1, :d_in].set(params["w1"])
    W = W.at[w_off["w2"]:w_off["w2"] + h1, :h1].set(params["w2"])
    W = W.at[w_off["w3"]:w_off["w3"] + h2, :h1].set(params["w3"])
    W = W.at[w_off["w4"]:w_off["w4"] + h2, :h2].set(params["w4"])
    W = W.at[w_off["w5"]:w_off["w5"] + 1, :h2].set(params["w5"])

    Bv = jnp.zeros((Rb, 1), jnp.float32)
    Bv = Bv.at[b_off["b1"]:b_off["b1"] + h1, 0].set(params["b1"])
    Bv = Bv.at[b_off["b2"]:b_off["b2"] + h1, 0].set(params["b2"])
    Bv = Bv.at[b_off["b3"]:b_off["b3"] + h2, 0].set(params["b3"])
    Bv = Bv.at[b_off["b4"]:b_off["b4"] + h2, 0].set(params["b4"])
    Bv = Bv.at[b_off["b5"], 0].set(params["b5"][0])

    return W.astype(jnp.bfloat16), Bv


# ---------------------------------------------------------------------------
# Kernel (batch lives in the lane dimension: activations are (features, tb)).
# ---------------------------------------------------------------------------
def _make_kernel(state_dim, action_dim, h1, h2, w_off, b_off):
    d_in = state_dim + action_dim

    def kernel(x_ref, w_ref, b_ref, o_ref):
        # x_ref: (d_in, tb) f32.  w_ref (bf16) / b_ref (f32) are VMEM-resident.
        def layer(h_bf16, w_name, b_name, rows, cols):
            w = w_ref[w_off[w_name]:w_off[w_name] + rows, :cols]    # (rows, cols) bf16
            b = b_ref[b_off[b_name]:b_off[b_name] + rows, :]        # (rows, 1)    f32
            h = jnp.dot(w, h_bf16, preferred_element_type=jnp.float32)  # (rows, tb)
            return _leaky_relu(h + b)                                # f32 bias/ReLU

        h = layer(x_ref[...].astype(jnp.bfloat16), "w1", "b1", h1, d_in)
        h = layer(h.astype(jnp.bfloat16), "w2", "b2", h1, h1)
        h = layer(h.astype(jnp.bfloat16), "w3", "b3", h2, h1)
        h = layer(h.astype(jnp.bfloat16), "w4", "b4", h2, h2)
        # Head: (1, h2) @ (h2, tb) -> lane-dense (1, tb) row.
        h = layer(h.astype(jnp.bfloat16), "w5", "b5", 1, h2)
        o_ref[...] = h.astype(o_ref.dtype)

    return kernel


def _choose_tiling(B):
    """Returns (padded_batch, lane_tile)."""
    if B < 256:
        return B, B  # single lane-resident block; splitting tiny B helps nobody
    # Lane-dense tiles (multiple of 128) with >= 2 grid steps so the
    # "parallel" batch axis actually splits across v7x's two TensorCores.
    n_steps = max(2, pl.cdiv(B, _MAX_TILE))
    tb = _round_up(pl.cdiv(B, n_steps), 128)
    return tb * n_steps, tb


def make_metacritic_forward(state_dim, action_dim, h1, h2):
    (w_off, Rw, Cw), (b_off, Rb) = _build_layout(state_dim, action_dim, h1, h2)
    kernel = _make_kernel(state_dim, action_dim, h1, h2, w_off, b_off)
    d_in = state_dim + action_dim

    @jax.jit
    def forward(state, action, w_packed, b_packed):
        B = state.shape[0]
        B_pad, tb = _choose_tiling(B)
        # Concat + transpose once in XLA (cheap / fusable): kernel input is
        # (d_in, B_pad) with the batch in lanes.
        x = jnp.concatenate([state, action], axis=-1)
        if B_pad != B:
            x = jnp.pad(x, ((0, B_pad - B), (0, 0)))
        x_t = x.T

        out_row = pl.pallas_call(
            kernel,
            out_shape=jax.ShapeDtypeStruct((1, B_pad), jnp.float32),
            grid=(B_pad // tb,),
            in_specs=[
                pl.BlockSpec((d_in, tb), lambda i: (0, i)),
                # Constant block index -> parameters stay VMEM-resident.
                pl.BlockSpec((Rw, Cw), lambda i: (0, 0)),
                pl.BlockSpec((Rb, 1), lambda i: (0, 0)),
            ],
            out_specs=pl.BlockSpec((1, tb), lambda i: (0, i)),
            compiler_params=pltpu.CompilerParams(
                dimension_semantics=("parallel",)),
        )(x_t, w_packed, b_packed)

        return out_row[0, :B].reshape(B, 1)

    return forward


# ---------------------------------------------------------------------------
# Init (mirrors the PyTorch module) + pure-JAX references
# ---------------------------------------------------------------------------
def init_params(key, state_dim, action_dim, h1, h2):
    d_in = state_dim + action_dim
    keys = jax.random.split(key, 10)

    def xavier_uniform(k, out_f, in_f):
        limit = jnp.sqrt(6.0 / (in_f + out_f))
        return jax.random.uniform(k, (out_f, in_f), jnp.float32, -limit, limit)

    def bias_default(k, out_f, in_f):
        bound = 1.0 / jnp.sqrt(in_f)
        return jax.random.uniform(k, (out_f,), jnp.float32, -bound, bound)

    return {
        "w1": xavier_uniform(keys[0], h1, d_in),
        "b1": bias_default(keys[1], h1, d_in),
        "w2": xavier_uniform(keys[2], h1, h1),
        "b2": bias_default(keys[3], h1, h1),
        "w3": xavier_uniform(keys[4], h2, h1),
        "b3": bias_default(keys[5], h2, h1),
        "w4": xavier_uniform(keys[6], h2, h2),
        "b4": bias_default(keys[7], h2, h2),
        "w5": jax.random.uniform(keys[8], (1, h2), jnp.float32, -0.3, 0.3),
        "b5": bias_default(keys[9], 1, h2),
    }


def reference_forward_f32(state, action, params):
    x = jnp.concatenate([state, action], axis=-1)
    for i in range(1, 6):
        x = x @ params[f"w{i}"].T + params[f"b{i}"]
        x = jnp.maximum(x, LEAKY_SLOPE * x)
    return x


def reference_forward_kernel_numerics(state, action, params):
    # Mirrors the kernel's numerics: bf16 matmul operands, f32 accumulate,
    # f32 bias add and LeakyReLU.
    x = jnp.concatenate([state, action], axis=-1)
    for i in range(1, 6):
        w = params[f"w{i}"].astype(jnp.bfloat16)
        x = jnp.dot(x.astype(jnp.bfloat16), w.T,
                    preferred_element_type=jnp.float32) + params[f"b{i}"]
        x = jnp.maximum(x, LEAKY_SLOPE * x)
    return x


if __name__ == "__main__":
    # Small shapes consistent with the module: batch=8, state_dim=6,
    # action_dim=2, metacritic_h1=32, metacritic_h2=16.
    B, STATE_DIM, ACTION_DIM, H1, H2 = 8, 6, 2, 32, 16

    key = jax.random.PRNGKey(0)
    k_state, k_action, k_params = jax.random.split(key, 3)

    state = jax.random.normal(k_state, (B, STATE_DIM), jnp.float32)
    action = jax.random.normal(k_action, (B, ACTION_DIM), jnp.float32)
    params = init_params(k_params, STATE_DIM, ACTION_DIM, H1, H2)

    # One-time parameter packing (kernel-ready layout); NOT in the hot path.
    w_packed, b_packed = jax.block_until_ready(
        pack_params(params, STATE_DIM, ACTION_DIM, H1, H2))

    forward = make_metacritic_forward(STATE_DIM, ACTION_DIM, H1, H2)
    out = jax.block_until_ready(forward(state, action, w_packed, b_packed))
    assert out.shape == (B, 1)

    # Exact-semantics check against a reference using the same bf16-weight /
    # f32-accumulate numerics as the kernel.
    ref_same = reference_forward_kernel_numerics(state, action, params)
    assert jnp.allclose(out, ref_same, atol=1e-4, rtol=1e-4), (
        "max abs diff vs kernel-numerics ref: "
        f"{float(jnp.max(jnp.abs(out - ref_same)))}")

    # Coarse sanity check vs the pure-f32 PyTorch-equivalent reference
    # (bf16 matmul operands introduce a small, expected drift).
    ref_f32 = reference_forward_f32(state, action, params)
    assert jnp.allclose(out, ref_f32, atol=1e-1, rtol=1e-1), (
        "max abs diff vs f32 ref: "
        f"{float(jnp.max(jnp.abs(out - ref_f32)))}")

    print("KERNEL_OK")
</pallas_src>

<mosaic_0001>
module attributes {stable_mosaic.version = 11 : i64} {
  func.func @kernel(%arg0: i32, %arg1: memref<8x8xf32, #tpu.memory_space<vmem>>, %arg2: memref<112x32xbf16, #tpu.memory_space<vmem>>, %arg3: memref<104x1xf32, #tpu.memory_space<vmem>>, %arg4: memref<1x8xf32, #tpu.memory_space<vmem>>) attributes {dimension_semantics = [#tpu.dimension_semantics<parallel>], iteration_bounds = array<i64: 1>, scalar_prefetch = 0 : i64, scratch_operands = 0 : i64, tpu.core_type = #tpu.core_type<tc>, window_params = [{transform_indices = @transform_0, window_bounds = array<i64: 8, 8>}, {pipeline_mode = #tpu.pipeline_mode<synchronous>, transform_indices = @transform_1, window_bounds = array<i64: 112, 32>}, {pipeline_mode = #tpu.pipeline_mode<synchronous>, transform_indices = @transform_2, window_bounds = array<i64: 104, 1>}, {transform_indices = @transform_3, window_bounds = array<i64: 1, 8>}]} {
    %c0 = arith.constant 0 : index
    %c0_0 = arith.constant 0 : index
    %0 = vector.load %arg1[%c0, %c0_0] : memref<8x8xf32, #tpu.memory_space<vmem>>, vector<8x8xf32>
    %1 = arith.truncf %0 : vector<8x8xf32> to vector<8x8xbf16>
    %c0_1 = arith.constant 0 : index
    %c0_2 = arith.constant 0 : index
    %2 = vector.load %arg2[%c0_1, %c0_2] : memref<112x32xbf16, #tpu.memory_space<vmem>>, vector<32x8xbf16>
    %c0_3 = arith.constant 0 : index
    %c0_4 = arith.constant 0 : index
    %3 = vector.load %arg3[%c0_3, %c0_4] : memref<104x1xf32, #tpu.memory_space<vmem>>, vector<32x1xf32>
    %cst = arith.constant dense<0.000000e+00> : vector<32x8xf32>
    %4 = tpu.matmul %2, %1, %cst {dimension_numbers = #tpu.dot_dimension_numbers<[1], [0], [0], [1], [0, 0, 1, 1], [], []>} : vector<32x8xbf16>, vector<8x8xbf16>, vector<32x8xf32> -> vector<32x8xf32>
    %5 = vector.broadcast %3 : vector<32x1xf32> to vector<32x8xf32>
    %6 = arith.addf %4, %5 : vector<32x8xf32>
    %cst_5 = arith.constant 0.00999999977 : f32
    %7 = vector.broadcast %cst_5 : f32 to vector<32x8xf32>
    %8 = arith.mulf %7, %6 : vector<32x8xf32>
    %9 = arith.maximumf %6, %8 : vector<32x8xf32>
    %10 = arith.truncf %9 : vector<32x8xf32> to vector<32x8xbf16>
    %c32 = arith.constant 32 : index
    %c0_6 = arith.constant 0 : index
    %11 = vector.load %arg2[%c32, %c0_6] : memref<112x32xbf16, #tpu.memory_space<vmem>>, vector<32x32xbf16>
    %c32_7 = arith.constant 32 : index
    %c0_8 = arith.constant 0 : index
    %12 = vector.load %arg3[%c32_7, %c0_8] : memref<104x1xf32, #tpu.memory_space<vmem>>, vector<32x1xf32>
    %cst_9 = arith.constant dense<0.000000e+00> : vector<32x8xf32>
    %13 = tpu.matmul %11, %10, %cst_9 {dimension_numbers = #tpu.dot_dimension_numbers<[1], [0], [0], [1], [0, 0, 1, 1], [], []>} : vector<32x32xbf16>, vector<32x8xbf16>, vector<32x8xf32> -> vector<32x8xf32>
    %14 = vector.broadcast %12 : vector<32x1xf32> to vector<32x8xf32>
    %15 = arith.addf %13, %14 : vector<32x8xf32>
    %cst_10 = arith.constant 0.00999999977 : f32
    %16 = vector.broadcast %cst_10 : f32 to vector<32x8xf32>
    %17 = arith.mulf %16, %15 : vector<32x8xf32>
    %18 = arith.maximumf %15, %17 : vector<32x8xf32>
    %19 = arith.truncf %18 : vector<32x8xf32> to vector<32x8xbf16>
    %c64 = arith.constant 64 : index
    %c0_11 = arith.constant 0 : index
    %20 = vector.load %arg2[%c64, %c0_11] : memref<112x32xbf16, #tpu.memory_space<vmem>>, vector<16x32xbf16>
    %c64_12 = arith.constant 64 : index
    %c0_13 = arith.constant 0 : index
    %21 = vector.load %arg3[%c64_12, %c0_13] : memref<104x1xf32, #tpu.memory_space<vmem>>, vector<16x1xf32>
    %cst_14 = arith.constant dense<0.000000e+00> : vector<16x8xf32>
    %22 = tpu.matmul %20, %19, %cst_14 {dimension_numbers = #tpu.dot_dimension_numbers<[1], [0], [0], [1], [0, 0, 1, 1], [], []>} : vector<16x32xbf16>, vector<32x8xbf16>, vector<16x8xf32> -> vector<16x8xf32>
    %23 = vector.broadcast %21 : vector<16x1xf32> to vector<16x8xf32>
    %24 = arith.addf %22, %23 : vector<16x8xf32>
    %cst_15 = arith.constant 0.00999999977 : f32
    %25 = vector.broadcast %cst_15 : f32 to vector<16x8xf32>
    %26 = arith.mulf %25, %24 : vector<16x8xf32>
    %27 = arith.maximumf %24, %26 : vector<16x8xf32>
    %28 = arith.truncf %27 : vector<16x8xf32> to vector<16x8xbf16>
    %c80 = arith.constant 80 : index
    %c0_16 = arith.constant 0 : index
    %29 = vector.load %arg2[%c80, %c0_16] : memref<112x32xbf16, #tpu.memory_space<vmem>>, vector<16x16xbf16>
    %c80_17 = arith.constant 80 : index
    %c0_18 = arith.constant 0 : index
    %30 = vector.load %arg3[%c80_17, %c0_18] : memref<104x1xf32, #tpu.memory_space<vmem>>, vector<16x1xf32>
    %cst_19 = arith.constant dense<0.000000e+00> : vector<16x8xf32>
    %31 = tpu.matmul %29, %28, %cst_19 {dimension_numbers = #tpu.dot_dimension_numbers<[1], [0], [0], [1], [0, 0, 1, 1], [], []>} : vector<16x16xbf16>, vector<16x8xbf16>, vector<16x8xf32> -> vector<16x8xf32>
    %32 = vector.broadcast %30 : vector<16x1xf32> to vector<16x8xf32>
    %33 = arith.addf %31, %32 : vector<16x8xf32>
    %cst_20 = arith.constant 0.00999999977 : f32
    %34 = vector.broadcast %cst_20 : f32 to vector<16x8xf32>
    %35 = arith.mulf %34, %33 : vector<16x8xf32>
    %36 = arith.maximumf %33, %35 : vector<16x8xf32>
    %37 = arith.truncf %36 : vector<16x8xf32> to vector<16x8xbf16>
    %c96 = arith.constant 96 : index
    %c0_21 = arith.constant 0 : index
    %38 = vector.load %arg2[%c96, %c0_21] : memref<112x32xbf16, #tpu.memory_space<vmem>>, vector<1x16xbf16>
    %c96_22 = arith.constant 96 : index
    %c0_23 = arith.constant 0 : index
    %39 = vector.load %arg3[%c96_22, %c0_23] : memref<104x1xf32, #tpu.memory_space<vmem>>, vector<1x1xf32>
    %cst_24 = arith.constant dense<0.000000e+00> : vector<1x8xf32>
    %40 = tpu.matmul %38, %37, %cst_24 {dimension_numbers = #tpu.dot_dimension_numbers<[1], [0], [0], [1], [0, 0, 1, 1], [], []>} : vector<1x16xbf16>, vector<16x8xbf16>, vector<1x8xf32> -> vector<1x8xf32>
    %41 = vector.broadcast %39 : vector<1x1xf32> to vector<1x8xf32>
    %42 = arith.addf %40, %41 : vector<1x8xf32>
    %cst_25 = arith.constant 0.00999999977 : f32
    %43 = vector.broadcast %cst_25 : f32 to vector<1x8xf32>
    %44 = arith.mulf %43, %42 : vector<1x8xf32>
    %45 = arith.maximumf %42, %44 : vector<1x8xf32>
    %c0_26 = arith.constant 0 : index
    %c0_27 = arith.constant 0 : index
    %46 = vector.load %arg4[%c0_26, %c0_27] : memref<1x8xf32, #tpu.memory_space<vmem>>, vector<1x8xf32>
    tpu.vector_store %arg4[%c0_26, %c0_27], %45 {strides = array<i32>} : memref<1x8xf32, #tpu.memory_space<vmem>>, vector<1x8xf32>,
    return
  }
  func.func @transform_0(%arg0: i32) -> (i32, i32) {
    %c0_i32 = arith.constant 0 : i32
    %c0_i32_0 = arith.constant 0 : i32
    return %c0_i32, %arg0 : i32, i32
  }
  func.func @transform_1(%arg0: i32) -> (i32, i32) {
    %c0_i32 = arith.constant 0 : i32
    %c0_i32_0 = arith.constant 0 : i32
    %c0_i32_1 = arith.constant 0 : i32
    return %c0_i32, %c0_i32_0 : i32, i32
  }
  func.func @transform_2(%arg0: i32) -> (i32, i32) {
    %c0_i32 = arith.constant 0 : i32
    %c0_i32_0 = arith.constant 0 : i32
    %c0_i32_1 = arith.constant 0 : i32
    return %c0_i32, %c0_i32_0 : i32, i32
  }
  func.func @transform_3(%arg0: i32) -> (i32, i32) {
    %c0_i32 = arith.constant 0 : i32
    %c0_i32_0 = arith.constant 0 : i32
    return %c0_i32, %arg0 : i32, i32
  }
}

</mosaic_0001>

<bundles_post_ra>
// kernel: forward.1
= control target key start
LH: loop header
LB: loop body
LE: loop exit
PB: predicated region body
PF: predicated region fallthrough
CT: control target
= control target key end

     0   :  { %vm63_vm0 = vcmask 1043456   ;;  %vm56_vm1 = vcmask 64512   ;;  %v531_v7 = vmov 0   ;;  %s629_s0 = inlined_call_operand.vmem [shape: f32[8,8], index: 0, kind: input, shape index: {}]   ;;  %s630_s1 = inlined_call_operand.vmem [shape: bf16[112,32], index: 1, kind: input, shape index: {}]   ;;  %s631_s2 = inlined_call_operand.vmem [shape: f32[104,1], index: 2, kind: input, shape index: {}]   ;;  %s632_s3 = inlined_call_operand.hbm [shape: f32[1,8], index: 3, kind: output, shape index: {}]  }
   0x1   :  { %v16_v0 = vld [vmem:[%s629_s0] sm:$0xff]  ;;  %v24_v3 = vld [vmem:[%s631_s2 + $0x10] sm:$0xff]  ;;  %v504_v5 = vld [vmem:[%s630_s1 + $0x8] sm:$0xff]   ;;  %501 = vset.pattern.permute.xlu0 %v531_v7  ;;  %502 = vset.pattern.permute.xlu1 %v531_v7 }
   0x2   :  { %v17_v1 = vpack.c.bf16 %v16_v0, %v16_v0  ;;  %v503_v2 = vld [vmem:[%s630_s1] sm:$0xff]   ;;  %38 = vperm.xlu0 %501, %v24_v3   ;;  %v25_v8 = vld [vmem:[%s631_s2 + $0x18] sm:$0xff]  ;;  %v23_v9 = vld [vmem:[%s631_s2 + $0x8] sm:$0xff] }
   0x3   :  { %464 = vmatprep.mubr.msk.bf16.mxu0 %vm56_vm1, %v503_v2  ;;  %v22_v6 = vld [vmem:[%s631_s2] sm:$0xff] }
   0x4   :  { %496 = vmatprep.subr.msk.bf16.mxu0 %vm63_vm0, %v17_v1  ;;  %v65_v4 = vsel %vm63_vm0, %v17_v1, 0  ;;  %28 = vperm.xlu1 %502, %v22_v6  }
   0x5   :  { %463 = vmatpush3.bf16.msra.mxu0 %v65_v4 }
   0x6   :  { %43 = vperm.xlu0 %501, %v25_v8  }
   0x8   :  { %465 = vmatmul.mubr.msk.bf16.vlgmr.msra.gmra.mxu0 %vm56_vm1, %v504_v5 }
   0x9   :  { %8 = vsyncpa [#allocation3], 0  ;;  %v132_v10 = vld [vmem:[%s631_s2 + $0x30] sm:$0xff]  ;;  %33 = vperm.xlu1 %502, %v23_v9   ;;  %v133_v11 = vld [vmem:[%s631_s2 + $0x38] sm:$0xff]  ;;  %vm164_vm2 = vcmask 261120   ;;  %v532_v43 = vmov 0.0  }
   0xa   :  { %146 = vperm.xlu0 %501, %v132_v10   ;;  %v130_v12 = vld [vmem:[%s631_s2 + $0x20] sm:$0xff]  ;;  %v131_v13 = vld [vmem:[%s631_s2 + $0x28] sm:$0xff]  ;;  %v300_v16 = vld [vmem:[%s631_s2 + $0x50] sm:$0xff]  ;;  %476 = vmatprep.subr.bf16.mxu0 %v532_v43  ;;  %vm533_vm3 = vmmov 0   ;;  %vm317_vm4 = vcmask 130048   ;;  %s534_s24 = smov [#allocation2]  }
   0xb   :  { %v232_v14 = vld [vmem:[%s631_s2 + $0x40] sm:$0xff]  ;;  %v233_v15 = vld [vmem:[%s631_s2 + $0x48] sm:$0xff]  ;;  %v301_v17 = vld [vmem:[%s631_s2 + $0x58] sm:$0xff]  ;;  %480 = vmatprep.mubr.msk.bf16.mxu0 %vm533_vm3, %v532_v43  ;;  %s427_s25 = sshll.u32 %s534_s24, 4  ;;  %vm419_vm5 = vcmask 57344   ;;  %s428_s25 = int_to_ptr.vmem [resolvable:$true] %s427_s25 }
   0xc   :  { %v368_v18 = vld [vmem:[%s631_s2 + $0x60] sm:$0x1]  ;;  %v505_v19 = vld [vmem:[%s630_s1 + $0x10] sm:$0xff]   ;;  %v506_v42 = vld [vmem:[%s630_s1 + $0x18] sm:$0xff]   ;;  %s509_s26 = scalar_lea.vmem %s428_s25, 16  ;;  %s513_s27 = scalar_lea.vmem %s428_s25, 32 }
   0xd   :  { %151 = vperm.xlu1 %502, %v133_v11   ;;  %472 = vmatprep.mubr.msk.bf16.mxu1 %vm164_vm2, %v505_v19  ;;  %v507_v2 = vld [vmem:[%s630_s1 + $0x20] sm:$0xff]   ;;  %p510_p0 = scmp.ne.s32.totalorder %s428_s25, %s509_s26  ;;  %p514_p1 = scmp.lt.s32.totalorder %s428_s25, %s428_s25 }
   0xe   :  { %136 = vperm.xlu0 %501, %v130_v12   ;;  %p515_p2 = scmp.lt.s32.totalorder %s513_s27, %s509_s26 }
  0x10   :  { %p516_p3 = por %p515_p2, %p514_p1 }
  0x11   :  { %141 = vperm.xlu1 %502, %v131_v13  }
  0x12   :  { %236 = vperm.xlu0 %501, %v232_v14   ;;  %p517_p4 = pnand %p516_p3, %p510_p0 }
  0x15   :  { %241 = vperm.xlu1 %502, %v233_v15  }
  0x16   :  { %304 = vperm.xlu0 %501, %v300_v16   ;;  %v508_v16 = vld [vmem:[%s630_s1 + $0x28] sm:$0xff]  }
  0x19   :  { %309 = vperm.xlu1 %502, %v301_v17  }
  0x1a   :  { %371 = vperm.xlu0 %501, %v368_v18  }
  0x7d   :  { %v39_v20 = vpop.permute.xlu0 %38 }
  0x7f   :  { %v29_v21 = vpop.permute.xlu1 %28 }
  0x81   :  { %v44_v26 = vpop.permute.xlu0 %43 }
  0x84   :  { %v34_v30 = vpop.permute.xlu1 %33 }
  0x85   :  { %v147_v44 = vpop.permute.xlu0 %146 }
  0x88   :  { %v152_v45 = vpop.permute.xlu1 %151 }
  0x89   :  { %v137_v49 = vpop.permute.xlu0 %136 }
  0x8c   :  { %v142_v54 = vpop.permute.xlu1 %141 }
  0x8d   :  { %v237_v3 = vpop.permute.xlu0 %236 }
  0x90   :  { %v242_v7 = vpop.permute.xlu1 %241 }
  0x91   :  { %v305_v17 = vpop.permute.xlu0 %304 }
  0xc8   :  { %v466_v22 = vpop.f32.mrf.mxu0 }
  0xc9   :  { %v110_v23 = vadd.f32 %v466_v22, %v39_v20 }
  0xca   :  { %v101_v24 = vpop.f32.mrf.mxu0 }
  0xcb   :  { %v102_v25 = vadd.f32 %v101_v24, %v29_v21  ;;  %v118_v28 = vmul.f32 0.01, %v110_v23  ;;  %v310_v21 = vpop.permute.xlu1 %309 }
  0xcc   :  { %v467_v27 = vpop.f32.mrf.mxu0 }
  0xcd   :  { %v113_v29 = vadd.f32 %v467_v27, %v44_v26  ;;  %v116_v32 = vmul.f32 0.01, %v102_v25  ;;  %v122_v35 = vmax.f32 %v110_v23, %v118_v28 }
  0xce   :  { %v104_v31 = vpop.f32.mrf.mxu0 }
  0xcf   :  { %v119_v33 = vmul.f32 0.01, %v113_v29  ;;  %v105_v34 = vadd.f32 %v104_v31, %v34_v30  ;;  %v120_v38 = vmax.f32 %v102_v25, %v116_v32  ;;  %v367_v30 = vld [vmem:[%s630_s1 + $0x30] sm:$0x1]  ;;  %v372_v31 = vpop.permute.xlu0 %371 }
  0xd1   :  { %v123_v36 = vmax.f32 %v113_v29, %v119_v33  ;;  %v117_v37 = vmul.f32 0.01, %v105_v34 }
  0xd3   :  { %v121_v39 = vmax.f32 %v105_v34, %v117_v37  ;;  %v125_v40 = vpack.c.bf16 %v123_v36, %v122_v35 }
  0xd5   :  { %468 = vmatprep.subr.bf16.mxu1 %v125_v40  ;;  %v124_v41 = vpack.c.bf16 %v121_v39, %v120_v38 }
  0xd6   :  { %469 = vmatpush3.bf16.msra.mxu1 %v125_v40 }
  0xd7   :  { %470 = vmatprep.subr.bf16.mxu1 %v124_v41 }
  0xda   :  { %471 = vmatpush3.bf16.msra.mxu1 %v124_v41 }
  0xdb   :  { %484 = vmatprep.subr.bf16.mxu1 %v532_v43 }
  0xdd   :  { %473 = vmatmul.mubr.msk.bf16.vlgmr.msra.gmra.mxu1 %vm164_vm2, %v506_v42 }
  0xde   :  { %486 = vmatprep.mubr.msk.bf16.mxu1 %vm533_vm3, %v532_v43 }
 0x19d   :  { %v474_v46 = vpop.f32.mrf.mxu1 }
 0x19e   :  { %v214_v47 = vadd.f32 %v474_v46, %v147_v44 }
 0x19f   :  { %v205_v48 = vpop.f32.mrf.mxu1 }
 0x1a0   :  { %v222_v51 = vmul.f32 0.01, %v214_v47  ;;  %v206_v52 = vadd.f32 %v205_v48, %v137_v49 }
 0x1a1   :  { %v475_v50 = vpop.f32.mrf.mxu1 }
 0x1a2   :  { %v217_v53 = vadd.f32 %v475_v50, %v152_v45  ;;  %v226_v58 = vmax.f32 %v214_v47, %v222_v51  ;;  %v220_v59 = vmul.f32 0.01, %v206_v52 }
 0x1a3   :  { %v208_v55 = vpop.f32.mrf.mxu1 }
 0x1a4   :  { %v223_v56 = vmul.f32 0.01, %v217_v53  ;;  %v209_v57 = vadd.f32 %v208_v55, %v142_v54  ;;  %v224_v0 = vmax.f32 %v206_v52, %v220_v59 }
 0x1a6   :  { %v227_v60 = vmax.f32 %v217_v53, %v223_v56  ;;  %v221_v61 = vmul.f32 0.01, %v209_v57 }
 0x1a8   :  { %v229_v62 = vpack.c.bf16 %v227_v60, %v226_v58  ;;  %v225_v63 = vmax.f32 %v209_v57, %v221_v61 }
 0x1aa   :  { %477 = vmatpush3.bf16.msra.mxu0 %v229_v62  ;;  %v228_v1 = vpack.c.bf16 %v225_v63, %v224_v0 }
 0x1ab   :  { %478 = vmatprep.subr.bf16.mxu0 %v532_v43 }
 0x1ae   :  { %479 = vmatpush3.bf16.msra.mxu0 %v228_v1 }
 0x1af   :  { %490 = vmatprep.subr.bf16.mxu0 %v532_v43 }
 0x1b1   :  { %481 = vmatmul.mubr.msk.bf16.vlgmr.msra.gmra.mxu0 %vm164_vm2, %v507_v2 }
 0x1b2   :  { %492 = vmatprep.mubr.msk.bf16.mxu0 %vm533_vm3, %v532_v43 }
 0x271   :  { %v286_v4 = vpop.f32.mrf.mxu0 }
 0x272   :  { %v287_v5 = vadd.f32 %v286_v4, %v237_v3 }
 0x273   :  { %v482_v6 = vpop.f32.mrf.mxu0 }
 0x274   :  { %v293_v9 = vmul.f32 0.01, %v287_v5 }
 0x275   :  { %v289_v8 = vpop.f32.mrf.mxu0 }
 0x276   :  { %v290_v10 = vadd.f32 %v289_v8, %v242_v7  ;;  %v295_v13 = vmax.f32 %v287_v5, %v293_v9 }
 0x277   :  { %v483_v11 = vpop.f32.mrf.mxu0 }
 0x278   :  { %v294_v12 = vmul.f32 0.01, %v290_v10 }
 0x27a   :  { %v296_v14 = vmax.f32 %v290_v10, %v294_v12 }
 0x27c   :  { %v297_v15 = vpack.c.bf16 %v296_v14, %v295_v13 }
 0x27e   :  { %485 = vmatpush3.bf16.msra.mxu1 %v297_v15 }
 0x281   :  { %487 = vmatmul.mubr.msk.bf16.vlgmr.msra.gmra.mxu1 %vm317_vm4, %v508_v16 }
 0x341   :  { %v355_v18 = vpop.f32.mrf.mxu1 }
 0x342   :  { %v356_v19 = vadd.f32 %v355_v18, %v305_v17 }
 0x343   :  { %v488_v20 = vpop.f32.mrf.mxu1 }
 0x344   :  { %v362_v23 = vmul.f32 0.01, %v356_v19 }
 0x345   :  { %v358_v22 = vpop.f32.mrf.mxu1 }
 0x346   :  { %v359_v24 = vadd.f32 %v358_v22, %v310_v21  ;;  %v364_v27 = vmax.f32 %v356_v19, %v362_v23 }
 0x347   :  { %v489_v25 = vpop.f32.mrf.mxu1 }
 0x348   :  { %v363_v26 = vmul.f32 0.01, %v359_v24 }
 0x34a   :  { %v365_v28 = vmax.f32 %v359_v24, %v363_v26 }
 0x34c   :  { %v366_v29 = vpack.c.bf16 %v365_v28, %v364_v27 }
 0x34e   :  { %491 = vmatpush3.bf16.msra.mxu0 %v366_v29 }
 0x351   :  { %493 = vmatmul.mubr.msk.bf16.vlgmr.msra.gmra.mxu0 %vm317_vm4, %v367_v30 }
 0x411   :  { %v411_v32 = vpop.f32.mrf.mxu0 }
 0x412   :  { %v412_v33 = vadd.f32 %v411_v32, %v372_v31 }
 0x413   :  { %v494_v34 = vpop.f32.mrf.mxu0 }
 0x414   :  { %v417_v35 = vmul.f32 0.01, %v412_v33 }
 0x415   :  { %v414_v36 = vpop.f32.mrf.mxu0 }
 0x416   :  { %v418_v37 = vmax.f32 %v412_v33, %v417_v35 }
 0x417   :  { %v495_v38 = vpop.f32.mrf.mxu0 }
 0x418   :  { %420 = vst.msk [vmem:[#allocation2] sm:$0x1] %vm419_vm5, %v418_v37 }
 0x419   :  { %520 = shalt.err (!%p517_p4)
}
 0x41a   :  { %430 = dma.vmem_to_hbm [thread:$0]  %s428_s25, 16, %s632_s3, [#allocation3]  }
 0x41b   :  { %529 = dma.done.wait [#allocation3], 16  }
 0x41c   :  { %530 = vsyncadd [#allocation3], 4294967280 }
 0x41d   :  { %434 = vsyncpa [#allocation3], 1 }

</bundles_post_ra>
